<compile_context>
chip_gen: v7x
topology: tpu7x:2x2x1
jax: 0.10.0
libtpu: 0.0.40
codegen_flags: <defaults>
</compile_context>

<pallas_src>
import jax
import jax.numpy as jnp
from jax.experimental import pallas as pl
from jax.experimental.pallas import tpu as pltpu


_UNROLL_C_MAX = 16  # unroll channel reductions on the VPU for small static C


def _softmax_layer_kernel(x_ref, o_ref):
    # x_ref / o_ref: [B, C, T_HW] float32 in VMEM (one HW tile)
    x = x_ref[...]
    B, C, T = x_ref.shape

    if C <= _UNROLL_C_MAX:
        # Unrolled VPU max/add over channel slices: avoids XLU cross-sublane
        # reduces on a sublane-padded (C < 8) axis.
        m = x[:, 0:1, :]
        for c in range(1, C):
            m = jnp.maximum(m, x[:, c:c + 1, :])            # [B, 1, T]
        e = jnp.exp(x - m)                                  # [B, C, T]
        s0 = e[0:1, 0:1, :]
        for c in range(1, C):
            s0 = s0 + e[0:1, c:c + 1, :]                    # [1, 1, T]
    else:
        m = jnp.max(x, axis=1, keepdims=True)               # [B, 1, T]
        e = jnp.exp(x - m)                                  # [B, C, T]
        s0 = jnp.sum(e[0:1, :, :], axis=1, keepdims=True)   # [1, 1, T]

    # One reciprocal per spatial column + broadcast multiply instead of
    # B*C*T divides.  approx=True would move this to the EUP slot, but its
    # few-ULP error may exceed the 1e-5 check, so stay exact here.
    inv = pl.reciprocal(s0, approx=False)                   # [1, 1, T]
    o_ref[...] = e * inv                                    # broadcasts over B, C


def _pick_tile_hw(B, C, HW):
    """Largest lane-dense (multiple-of-128) HW tile that double-buffers
    comfortably inside scoped VMEM on every TPU generation (incl. v7x)."""
    if HW % 128 != 0:
        # Full-extent last dim is always a legal block; avoids partial lanes.
        return HW
    # 2 arrays (in + out) x 2 pipeline buffers x B*C*t*4 bytes  <= ~16 MiB
    budget_bytes = 16 * 1024 * 1024
    max_t = budget_bytes // (4 * 2 * 2 * max(B * C, 1))
    t = max(128, (max_t // 128) * 128)
    t = min(t, 2048, HW)   # 512-2048 is the measured v6e sweet spot; safe on v7x
    return t


def softmax_layer(x, *, t_hw=None):
    """Pallas implementation of Softmax_layer.forward for NCHW input."""
    B, C, H, W = x.shape
    HW = H * W
    xf = x.reshape(B, C, HW)

    if t_hw is None:
        t_hw = _pick_tile_hw(B, C, HW)

    grid = (pl.cdiv(HW, t_hw),)

    out = pl.pallas_call(
        _softmax_layer_kernel,
        out_shape=jax.ShapeDtypeStruct((B, C, HW), x.dtype),
        grid=grid,
        # Keep B and C whole per block (channel reduction + batch-0 denominator
        # need them); tile only the independent HW lane axis.
        in_specs=[pl.BlockSpec((B, C, t_hw), lambda i: (0, 0, i))],
        out_specs=pl.BlockSpec((B, C, t_hw), lambda i: (0, 0, i)),
        # HW columns are fully independent -> "parallel" shards across the two
        # TensorCores on v7x; no-op on v5e/v6e.
        compiler_params=pltpu.CompilerParams(
            dimension_semantics=("parallel",)),
    )(xf)

    return out.reshape(B, C, H, W)


def _reference(x):
    # Pure-JAX reproduction of the PyTorch forward (including the [0] quirk).
    m = jnp.max(x, axis=1, keepdims=True)
    e = jnp.exp(x - m)
    summ = jnp.sum(e, axis=1, keepdims=True)[0]              # shape [1, H, W]
    return e / summ


if __name__ == "__main__":
    key = jax.random.PRNGKey(0)
    x = jax.random.normal(key, (2, 4, 16, 16), dtype=jnp.float32)

    y_ref = _reference(x)

    # Default (auto-sized) tile: single 256-wide block at this tiny shape.
    y = jax.block_until_ready(softmax_layer(x))
    assert y.shape == x.shape
    assert jnp.allclose(y, y_ref, atol=1e-5, rtol=1e-5), "mismatch vs reference"

    # Forced smaller tile -> grid=(2,): exercises the pipelined multi-tile path.
    y_tiled = jax.block_until_ready(softmax_layer(x, t_hw=128))
    assert jnp.allclose(y_tiled, y_ref, atol=1e-5, rtol=1e-5), "tiled mismatch"

    print("KERNEL_OK")
</pallas_src>

<mosaic_0001>
module attributes {stable_mosaic.version = 11 : i64} {
  func.func @_softmax_layer_kernel(%arg0: i32, %arg1: memref<2x4x256xf32, #tpu.memory_space<vmem>>, %arg2: memref<2x4x256xf32, #tpu.memory_space<vmem>>) attributes {dimension_semantics = [#tpu.dimension_semantics<parallel>], iteration_bounds = array<i64: 1>, scalar_prefetch = 0 : i64, scratch_operands = 0 : i64, tpu.core_type = #tpu.core_type<tc>, window_params = [{transform_indices = @transform_0, window_bounds = array<i64: 2, 4, 256>}, {transform_indices = @transform_1, window_bounds = array<i64: 2, 4, 256>}]} {
    %c0 = arith.constant 0 : index
    %c0_0 = arith.constant 0 : index
    %c0_1 = arith.constant 0 : index
    %0 = vector.load %arg1[%c0, %c0_0, %c0_1] : memref<2x4x256xf32, #tpu.memory_space<vmem>>, vector<2x4x256xf32>
    %1 = vector.extract_strided_slice %0 {offsets = [0, 0, 0], sizes = [2, 1, 256], strides = [1, 1, 1]} : vector<2x4x256xf32> to vector<2x1x256xf32>
    %2 = vector.extract_strided_slice %0 {offsets = [0, 1, 0], sizes = [2, 1, 256], strides = [1, 1, 1]} : vector<2x4x256xf32> to vector<2x1x256xf32>
    %3 = arith.maximumf %1, %2 : vector<2x1x256xf32>
    %4 = vector.extract_strided_slice %0 {offsets = [0, 2, 0], sizes = [2, 1, 256], strides = [1, 1, 1]} : vector<2x4x256xf32> to vector<2x1x256xf32>
    %5 = arith.maximumf %3, %4 : vector<2x1x256xf32>
    %6 = vector.extract_strided_slice %0 {offsets = [0, 3, 0], sizes = [2, 1, 256], strides = [1, 1, 1]} : vector<2x4x256xf32> to vector<2x1x256xf32>
    %7 = arith.maximumf %5, %6 : vector<2x1x256xf32>
    %8 = vector.broadcast %7 : vector<2x1x256xf32> to vector<2x4x256xf32>
    %9 = arith.subf %0, %8 : vector<2x4x256xf32>
    %10 = math.exp %9 : vector<2x4x256xf32>
    %11 = vector.extract_strided_slice %10 {offsets = [0, 0, 0], sizes = [1, 1, 256], strides = [1, 1, 1]} : vector<2x4x256xf32> to vector<1x1x256xf32>
    %12 = vector.extract_strided_slice %10 {offsets = [0, 1, 0], sizes = [1, 1, 256], strides = [1, 1, 1]} : vector<2x4x256xf32> to vector<1x1x256xf32>
    %13 = arith.addf %11, %12 : vector<1x1x256xf32>
    %14 = vector.extract_strided_slice %10 {offsets = [0, 2, 0], sizes = [1, 1, 256], strides = [1, 1, 1]} : vector<2x4x256xf32> to vector<1x1x256xf32>
    %15 = arith.addf %13, %14 : vector<1x1x256xf32>
    %16 = vector.extract_strided_slice %10 {offsets = [0, 3, 0], sizes = [1, 1, 256], strides = [1, 1, 1]} : vector<2x4x256xf32> to vector<1x1x256xf32>
    %17 = arith.addf %15, %16 : vector<1x1x256xf32>
    %18 = tpu.reciprocal %17 : vector<1x1x256xf32> -> vector<1x1x256xf32>
    %19 = vector.broadcast %18 : vector<1x1x256xf32> to vector<2x4x256xf32>
    %20 = arith.mulf %10, %19 : vector<2x4x256xf32>
    %c0_2 = arith.constant 0 : index
    %c0_3 = arith.constant 0 : index
    %c0_4 = arith.constant 0 : index
    %21 = vector.load %arg2[%c0_2, %c0_3, %c0_4] : memref<2x4x256xf32, #tpu.memory_space<vmem>>, vector<2x4x256xf32>
    tpu.vector_store %arg2[%c0_2, %c0_3, %c0_4], %20 {strides = array<i32>} : memref<2x4x256xf32, #tpu.memory_space<vmem>>, vector<2x4x256xf32>,
    return
  }
  func.func @transform_0(%arg0: i32) -> (i32, i32, i32) {
    %c0_i32 = arith.constant 0 : i32
    %c0_i32_0 = arith.constant 0 : i32
    %c0_i32_1 = arith.constant 0 : i32
    return %c0_i32, %c0_i32_0, %arg0 : i32, i32, i32
  }
  func.func @transform_1(%arg0: i32) -> (i32, i32, i32) {
    %c0_i32 = arith.constant 0 : i32
    %c0_i32_0 = arith.constant 0 : i32
    %c0_i32_1 = arith.constant 0 : i32
    return %c0_i32, %c0_i32_0, %arg0 : i32, i32, i32
  }
}

</mosaic_0001>

<bundles_post_ra>
// kernel: tpu_custom_call.1
= control target key start
LH: loop header
LB: loop body
LE: loop exit
PB: predicated region body
PF: predicated region fallthrough
CT: control target
= control target key end

     0   :  { %6 = vsyncpa [#allocation3], 0  ;;  %s272_s0 = inlined_call_operand.hbm [shape: f32[2,4,256], index: 0, kind: input, shape index: {}]   ;;  %s273_s1 = inlined_call_operand.hbm [shape: f32[2,4,256], index: 1, kind: output, shape index: {}]  }
   0x1   :  { %7 = vsyncpa [#allocation4], 0  ;;  %s228_s6 = smov [#allocation2]   ;;  %s180_s10 = scalar_lea.hbm %s272_s0, 256 }
   0x2   :  { %s13_s7 = sshll.u32 %s228_s6, 4  ;;  %p181_p0 = scmp.ne.s32.totalorder %s272_s0, %s180_s10  ;;  %s14_s7 = int_to_ptr.vmem [resolvable:$true] %s13_s7 }
   0x3   :  { %p184_p1 = scmp.lt.u32.totalorder %s180_s10, %s272_s0 }
   0x5   :  { %p186_p2 = pnand %p184_p1, %p181_p0 }
   0x7   :  { %189 = shalt.err (!%p186_p2)
}
   0x8   :  { %s190_s15 = scalar_lea.vmem %s14_s7, 256  ;;  %p195_p4 = scmp.lt.s32.totalorder %s14_s7, %s14_s7 }
   0x9   :  { %p191_p3 = scmp.ne.s32.totalorder %s14_s7, %s190_s15  ;;  %p196_p5 = scmp.lt.s32.totalorder %s190_s15, %s190_s15 }
   0xb   :  { %p197_p6 = por %p196_p5, %p195_p4 }
   0xd   :  { %p198_p7 = pnand %p197_p6, %p191_p3 }
   0xf   :  { %201 = shalt.err (!%p198_p7)
}
  0x10   :  { %s229_s16 = smov 128   ;;  %s230_s17 = smov 8  }
  0x11   :  { %19 = dma.hbm_to_vmem [thread:$0]  %s272_s0, 256, %s14_s7, [#allocation3], %s229_s16, %s229_s16, %s230_s17  }
  0x12   :  { %224 = dma.done.wait [#allocation3], 256  }
  0x13   :  { %225 = vsyncadd [#allocation3], 4294967040  ;;  %v53_v0 = vlaneseq  ;;  %v23_v1 = vld [vmem:[#allocation2] sm:$0xff]  ;;  %v24_v5 = vld [vmem:[#allocation2 + $0x8] sm:$0xff]  ;;  %s231_s0 = smov [#allocation5]  }
  0x14   :  { %v161_v2 = vrot.slane %v23_v1, 9  ;;  %v163_v3 = vrot.slane %v23_v1, 10  ;;  %v165_v7 = vrot.slane %v23_v1, 11  ;;  %v162_v11 = vrot.slane %v24_v5, 9  ;;  %s149_s20 = sshll.u32 %s231_s0, 4  ;;  %s150_s20 = int_to_ptr.vmem [resolvable:$true] %s149_s20 }
  0x15   :  { %v54_v4 = vshrl.u32 %v53_v0, 7  ;;  %v164_v16 = vrot.slane %v24_v5, 10  ;;  %v166_v21 = vrot.slane %v24_v5, 11  ;;  %s202_s21 = scalar_lea.vmem %s150_s20, 256  ;;  %p207_p9 = scmp.lt.s32.totalorder %s150_s20, %s150_s20 }
  0x16   :  { %v33_v6 = vmax.f32 %v23_v1, %v161_v2  ;;  %v34_v15 = vmax.f32 %v24_v5, %v162_v11  ;;  %p203_p8 = scmp.ne.s32.totalorder %s150_s20, %s202_s21  ;;  %p208_p10 = scmp.lt.s32.totalorder %s202_s21, %s202_s21 }
  0x17   :  { %v55_v9 = vsub.s32 0, %v54_v4  ;;  %v59_v10 = vsub.s32 4, %v54_v4 }
  0x18   :  { %v41_v8 = vmax.f32 %v33_v6, %v163_v3  ;;  %v42_v20 = vmax.f32 %v34_v15, %v164_v16  ;;  %p209_p11 = por %p208_p10, %p207_p9 }
  0x1a   :  { %v49_v12 = vmax.f32 %v41_v8, %v165_v7  ;;  %v50_v24 = vmax.f32 %v42_v20, %v166_v21  ;;  %p210_p12 = pnand %p209_p11, %p203_p8 }
  0x1c   :  { %v56_v13 = vrot.slane %v49_v12, %v55_v9  ;;  %v60_v14 = vrot.slane %v49_v12, %v59_v10  ;;  %v68_v25 = vrot.slane %v50_v24, %v59_v10  ;;  %v64_v26 = vrot.slane %v50_v24, %v55_v9 }
  0x1e   :  { %v76_v17 = vrot.slane %v56_v13, %v55_v9  ;;  %v80_v18 = vrot.slane %v60_v14, %v55_v9  ;;  %v84_v27 = vrot.slane %v64_v26, %v55_v9  ;;  %v88_v28 = vrot.slane %v68_v25, %v55_v9 }
  0x20   :  { %v93_v19 = vcombine.low %v76_v17, %v80_v18  ;;  %v94_v32 = vcombine.low %v84_v27, %v88_v28 }
  0x22   :  { %v97_v22 = vsub.f32 %v23_v1, %v93_v19  ;;  %v98_v36 = vsub.f32 %v24_v5, %v94_v32 }
  0x24   :  { %v99_v23 = vmul.f32 1.442695, %v97_v22  ;;  %v101_v38 = vmul.f32 1.442695, %v98_v36 }
  0x26   :  { %174 = vpow2.f32 %v99_v23 }
  0x30   :  { %v175_v29 = vpop.eup %174 }
  0x31   :  { %v167_v30 = vrot.slane %v175_v29, 9  ;;  %v168_v31 = vrot.slane %v175_v29, 10  ;;  %v169_v34 = vrot.slane %v175_v29, 11 }
  0x33   :  { %v107_v33 = vadd.f32 %v175_v29, %v167_v30 }
  0x35   :  { %v111_v35 = vadd.f32 %v168_v31, %v107_v33 }
  0x37   :  { %v115_v37 = vadd.f32 %v169_v34, %v111_v35 }
  0x39   :  { %176 = vrcp.f32 %v115_v37 }
  0x3a   :  { %178 = vpow2.f32 %v101_v38 }
  0x43   :  { %v177_v39 = vpop.eup %176 }
  0x44   :  { %v121_v40 = vrot.slane %v177_v39, %v55_v9  ;;  %v125_v41 = vrot.slane %v177_v39, %v59_v10  ;;  %v179_v44 = vpop.eup %178 }
  0x46   :  { %v131_v42 = vrot.slane %v121_v40, %v55_v9  ;;  %v135_v43 = vrot.slane %v125_v41, %v55_v9 }
  0x48   :  { %v138_v45 = vcombine.low %v131_v42, %v135_v43 }
  0x4a   :  { %v140_v46 = vmul.f32 %v175_v29, %v138_v45  ;;  %v141_v47 = vmul.f32 %v179_v44, %v138_v45 }
  0x4c   :  { %142 = vst [vmem:[#allocation5] sm:$0xff] %v140_v46  ;;  %143 = vst [vmem:[#allocation5 + $0x8] sm:$0xff] %v141_v47 }
  0x4d   :  { %213 = shalt.err (!%p210_p12)
}
  0x4e   :  { %s214_s24 = scalar_lea.hbm %s273_s1, 256 }
  0x4f   :  { %p215_p13 = scmp.ne.s32.totalorder %s273_s1, %s214_s24  ;;  %p218_p0 = scmp.lt.u32.totalorder %s214_s24, %s273_s1 }
  0x51   :  { %p220_p1 = pnand %p218_p0, %p215_p13 }
  0x53   :  { %223 = shalt.err (!%p220_p1)
}
  0x54   :  { %155 = dma.vmem_to_hbm [thread:$0]  %s150_s20, 256, %s273_s1, [#allocation4], %s229_s16, %s229_s16, %s230_s17  }
  0x55   :  { %226 = dma.done.wait [#allocation4], 256  }
  0x56   :  { %227 = vsyncadd [#allocation4], 4294967040 }
  0x57   :  { %159 = vsyncpa [#allocation3], 1 }
  0x58   :  { %160 = vsyncpa [#allocation4], 1 }

</bundles_post_ra>
